<compile_context>
chip_gen: v6e
topology: v6e:2x2x1
jax: 0.10.0
libtpu: 0.0.40
codegen_flags: <defaults>
</compile_context>

<pallas_src>
import math

import jax
import jax.numpy as jnp
from jax.experimental import pallas as pl
from jax.experimental.pallas import tpu as pltpu

H1_DIM, H2_DIM = 256, 512


def _round_up(x, m):
    return ((x + m - 1) // m) * m


def generator_kernel(x_ref, w1_ref, b1_ref, w2_ref, b2_ref, w3_ref, b3_ref, o_ref):
    # x arrives f32; cast to bf16 at point of use (cast hides under the MXU).
    x = x_ref[...].astype(jnp.bfloat16)
    # Layer 1: Linear(in, 256) + ReLU — bf16 operands, f32 accumulation/epilogue.
    h1 = jnp.dot(x, w1_ref[...], preferred_element_type=jnp.float32)
    h1 = jnp.maximum(h1 + b1_ref[...], 0.0)
    # Layer 2: Linear(256, 512) + ReLU
    h2 = jnp.dot(h1.astype(jnp.bfloat16), w2_ref[...],
                 preferred_element_type=jnp.float32)
    h2 = jnp.maximum(h2 + b2_ref[...], 0.0)
    # Layer 3: Linear(512, out_pad) + Tanh (out dim lane-padded to 128)
    h3 = jnp.dot(h2.astype(jnp.bfloat16), w3_ref[...],
                 preferred_element_type=jnp.float32)
    o_ref[...] = jnp.tanh(h3 + b3_ref[...]).astype(o_ref.dtype)


def prepare_params(params):
    """One-time weight prep: cast to bf16 (MXU-native), lane-pad w3/b3 to 128.

    Returns (prepped_dict, out_dim).  Call once and reuse across forward calls.
    """
    out_dim = params["w3"].shape[1]
    out_pad = _round_up(out_dim, 128)
    prepped = {
        "w1": params["w1"].astype(jnp.bfloat16),
        "b1": params["b1"].astype(jnp.float32),
        "w2": params["w2"].astype(jnp.bfloat16),
        "b2": params["b2"].astype(jnp.float32),
        "w3": jnp.pad(params["w3"],
                      ((0, 0), (0, out_pad - out_dim))).astype(jnp.bfloat16),
        "b3": jnp.pad(params["b3"],
                      ((0, 0), (0, out_pad - out_dim))).astype(jnp.float32),
    }
    return prepped, out_dim


def generator_forward(x, prepped, out_dim, *, batch_tile=1024):
    """x: (B, input_size) float32.  prepped: output of prepare_params."""
    w1, b1 = prepped["w1"], prepped["b1"]
    w2, b2 = prepped["w2"], prepped["b2"]
    w3, b3 = prepped["w3"], prepped["b3"]

    B, in_dim = x.shape
    h1_dim, h2_dim = w1.shape[1], w2.shape[1]
    out_pad = w3.shape[1]

    # --- Tile / grid selection: minimal padding, >=2 steps for large B (v7x). ---
    g = max(1, pl.cdiv(B, batch_tile))
    if B >= 1024 and g % 2 == 1:
        g += 1                       # keep both v7x TensorCores busy
    tile = _round_up(pl.cdiv(B, g), 16)   # 16-row granularity (bf16 sublanes)
    B_pad = _round_up(B, tile)
    grid = (B_pad // tile,)

    # Only row-pad x (no lane pad, no cast — kernel reads f32, casts in-VMEM).
    x_p = x if B_pad == B else jnp.pad(x, ((0, B_pad - B), (0, 0)))

    def full_block(arr):
        # Constant block index across the grid -> kept resident, no re-DMA.
        return pl.BlockSpec(arr.shape, lambda i: (0, 0))

    flops = 2 * B_pad * (in_dim * h1_dim + h1_dim * h2_dim + h2_dim * out_pad)
    bytes_accessed = (
        x_p.size * 4
        + w1.size * 2 + w2.size * 2 + w3.size * 2
        + b1.size * 4 + b2.size * 4 + b3.size * 4
        + B_pad * out_pad * 4
    )
    cost = pl.CostEstimate(
        flops=flops,
        transcendentals=B_pad * out_pad,   # tanh on the output tile
        bytes_accessed=bytes_accessed,
    )

    out_padded = pl.pallas_call(
        generator_kernel,
        out_shape=jax.ShapeDtypeStruct((B_pad, out_pad), jnp.float32),
        grid_spec=pltpu.PrefetchScalarGridSpec(
            num_scalar_prefetch=0,
            grid=grid,
            in_specs=[
                # x block: (tile, in_dim); last dim == full array dim is legal,
                # Mosaic lane-pads the VMEM layout internally.
                pl.BlockSpec((tile, in_dim), lambda i: (i, 0)),
                full_block(w1), full_block(b1),
                full_block(w2), full_block(b2),
                full_block(w3), full_block(b3),
            ],
            out_specs=pl.BlockSpec((tile, out_pad), lambda i: (i, 0)),
        ),
        compiler_params=pltpu.CompilerParams(
            dimension_semantics=("parallel",),  # batch tiles independent -> megacore
        ),
        cost_estimate=cost,
    )(x_p, w1, b1, w2, b2, w3, b3)

    # TODO(synk): if the consumer tolerates the padded (B_pad, 128) slab, return
    # it directly to skip this extra read+write of the output.
    return out_padded[:B, :out_dim]


def init_params(key, input_size, output_size):
    """PyTorch nn.Linear default init (U[-1/sqrt(fan_in), 1/sqrt(fan_in)]).
    Weights stored transposed: (in_features, out_features); biases (1, out)."""
    dims = [(input_size, H1_DIM), (H1_DIM, H2_DIM), (H2_DIM, output_size)]
    params = {}
    for idx, (fan_in, fan_out) in enumerate(dims, start=1):
        key, kw, kb = jax.random.split(key, 3)
        bound = 1.0 / math.sqrt(fan_in)
        params[f"w{idx}"] = jax.random.uniform(
            kw, (fan_in, fan_out), jnp.float32, minval=-bound, maxval=bound)
        params[f"b{idx}"] = jax.random.uniform(
            kb, (1, fan_out), jnp.float32, minval=-bound, maxval=bound)
    return params


def generator_reference_f32(x, params):
    h1 = jnp.maximum(x @ params["w1"] + params["b1"], 0.0)
    h2 = jnp.maximum(h1 @ params["w2"] + params["b2"], 0.0)
    return jnp.tanh(h2 @ params["w3"] + params["b3"])


def generator_reference_mixed(x, params):
    # Emulates the kernel's precision: bf16 matmul operands, f32 accumulate/epilogue.
    def mm(a, w):
        return jnp.dot(a.astype(jnp.bfloat16), w.astype(jnp.bfloat16),
                       preferred_element_type=jnp.float32)
    h1 = jnp.maximum(mm(x, params["w1"]) + params["b1"], 0.0)
    h2 = jnp.maximum(mm(h1, params["w2"]) + params["b2"], 0.0)
    return jnp.tanh(mm(h2, params["w3"]) + params["b3"])


if __name__ == "__main__":
    key = jax.random.PRNGKey(0)
    input_size, output_size, batch = 32, 64, 8

    kp, kx = jax.random.split(key)
    params = init_params(kp, input_size, output_size)
    x = jax.random.normal(kx, (batch, input_size), jnp.float32)

    # One-time weight prep (bf16 cast + lane-pad), reused across calls.
    prepped, out_dim = prepare_params(params)

    out = jax.block_until_ready(generator_forward(x, prepped, out_dim))
    assert out.shape == (batch, output_size)

    ref_mixed = generator_reference_mixed(x, params)
    ref_f32 = generator_reference_f32(x, params)
    assert jnp.allclose(out, ref_mixed, atol=1e-3, rtol=1e-3), \
        "Pallas output mismatch vs mixed-precision reference"
    assert jnp.allclose(out, ref_f32, atol=2e-2, rtol=2e-2), \
        "Pallas output mismatch vs f32 reference"

    print("KERNEL_OK")
</pallas_src>

<mosaic_0001>
module attributes {stable_mosaic.version = 11 : i64} {
  func.func @generator_kernel(%arg0: i32, %arg1: memref<16x32xf32, #tpu.memory_space<vmem>>, %arg2: memref<32x256xbf16, #tpu.memory_space<vmem>>, %arg3: memref<1x256xf32, #tpu.memory_space<vmem>>, %arg4: memref<256x512xbf16, #tpu.memory_space<vmem>>, %arg5: memref<1x512xf32, #tpu.memory_space<vmem>>, %arg6: memref<512x128xbf16, #tpu.memory_space<vmem>>, %arg7: memref<1x128xf32, #tpu.memory_space<vmem>>, %arg8: memref<16x128xf32, #tpu.memory_space<vmem>>) attributes {dimension_semantics = [#tpu.dimension_semantics<parallel>], iteration_bounds = array<i64: 1>, scalar_prefetch = 0 : i64, scratch_operands = 0 : i64, tpu.core_type = #tpu.core_type<tc>, window_params = [{transform_indices = @transform_0, window_bounds = array<i64: 16, 32>}, {pipeline_mode = #tpu.pipeline_mode<synchronous>, transform_indices = @transform_1, window_bounds = array<i64: 32, 256>}, {pipeline_mode = #tpu.pipeline_mode<synchronous>, transform_indices = @transform_2, window_bounds = array<i64: 1, 256>}, {pipeline_mode = #tpu.pipeline_mode<synchronous>, transform_indices = @transform_3, window_bounds = array<i64: 256, 512>}, {pipeline_mode = #tpu.pipeline_mode<synchronous>, transform_indices = @transform_4, window_bounds = array<i64: 1, 512>}, {pipeline_mode = #tpu.pipeline_mode<synchronous>, transform_indices = @transform_5, window_bounds = array<i64: 512, 128>}, {pipeline_mode = #tpu.pipeline_mode<synchronous>, transform_indices = @transform_6, window_bounds = array<i64: 1, 128>}, {transform_indices = @transform_7, window_bounds = array<i64: 16, 128>}]} {
    %c0 = arith.constant 0 : index
    %c0_0 = arith.constant 0 : index
    %0 = vector.load %arg1[%c0, %c0_0] : memref<16x32xf32, #tpu.memory_space<vmem>>, vector<16x32xf32>
    %1 = arith.truncf %0 : vector<16x32xf32> to vector<16x32xbf16>
    %c0_1 = arith.constant 0 : index
    %c0_2 = arith.constant 0 : index
    %2 = vector.load %arg2[%c0_1, %c0_2] : memref<32x256xbf16, #tpu.memory_space<vmem>>, vector<32x256xbf16>
    %cst = arith.constant dense<0.000000e+00> : vector<16x256xf32>
    %3 = tpu.matmul %1, %2, %cst {dimension_numbers = #tpu.dot_dimension_numbers<[1], [0], [0], [1], [0, 0, 1, 1], [], []>} : vector<16x32xbf16>, vector<32x256xbf16>, vector<16x256xf32> -> vector<16x256xf32>
    %c0_3 = arith.constant 0 : index
    %c0_4 = arith.constant 0 : index
    %4 = vector.load %arg3[%c0_3, %c0_4] : memref<1x256xf32, #tpu.memory_space<vmem>>, vector<1x256xf32>
    %5 = vector.broadcast %4 : vector<1x256xf32> to vector<16x256xf32>
    %6 = arith.addf %3, %5 : vector<16x256xf32>
    %cst_5 = arith.constant 0.000000e+00 : f32
    %7 = vector.broadcast %cst_5 : f32 to vector<16x256xf32>
    %8 = arith.maximumf %6, %7 : vector<16x256xf32>
    %9 = arith.truncf %8 : vector<16x256xf32> to vector<16x256xbf16>
    %c0_6 = arith.constant 0 : index
    %c0_7 = arith.constant 0 : index
    %10 = vector.load %arg4[%c0_6, %c0_7] : memref<256x512xbf16, #tpu.memory_space<vmem>>, vector<256x512xbf16>
    %cst_8 = arith.constant dense<0.000000e+00> : vector<16x512xf32>
    %11 = tpu.matmul %9, %10, %cst_8 {dimension_numbers = #tpu.dot_dimension_numbers<[1], [0], [0], [1], [0, 0, 1, 1], [], []>} : vector<16x256xbf16>, vector<256x512xbf16>, vector<16x512xf32> -> vector<16x512xf32>
    %c0_9 = arith.constant 0 : index
    %c0_10 = arith.constant 0 : index
    %12 = vector.load %arg5[%c0_9, %c0_10] : memref<1x512xf32, #tpu.memory_space<vmem>>, vector<1x512xf32>
    %13 = vector.broadcast %12 : vector<1x512xf32> to vector<16x512xf32>
    %14 = arith.addf %11, %13 : vector<16x512xf32>
    %cst_11 = arith.constant 0.000000e+00 : f32
    %15 = vector.broadcast %cst_11 : f32 to vector<16x512xf32>
    %16 = arith.maximumf %14, %15 : vector<16x512xf32>
    %17 = arith.truncf %16 : vector<16x512xf32> to vector<16x512xbf16>
    %c0_12 = arith.constant 0 : index
    %c0_13 = arith.constant 0 : index
    %18 = vector.load %arg6[%c0_12, %c0_13] : memref<512x128xbf16, #tpu.memory_space<vmem>>, vector<512x128xbf16>
    %cst_14 = arith.constant dense<0.000000e+00> : vector<16x128xf32>
    %19 = tpu.matmul %17, %18, %cst_14 {dimension_numbers = #tpu.dot_dimension_numbers<[1], [0], [0], [1], [0, 0, 1, 1], [], []>} : vector<16x512xbf16>, vector<512x128xbf16>, vector<16x128xf32> -> vector<16x128xf32>
    %c0_15 = arith.constant 0 : index
    %c0_16 = arith.constant 0 : index
    %20 = vector.load %arg7[%c0_15, %c0_16] : memref<1x128xf32, #tpu.memory_space<vmem>>, vector<1x128xf32>
    %21 = vector.broadcast %20 : vector<1x128xf32> to vector<16x128xf32>
    %22 = arith.addf %19, %21 : vector<16x128xf32>
    %23 = math.tanh %22 : vector<16x128xf32>
    %c0_17 = arith.constant 0 : index
    %c0_18 = arith.constant 0 : index
    %24 = vector.load %arg8[%c0_17, %c0_18] : memref<16x128xf32, #tpu.memory_space<vmem>>, vector<16x128xf32>
    tpu.vector_store %arg8[%c0_17, %c0_18], %23 {strides = array<i32>} : memref<16x128xf32, #tpu.memory_space<vmem>>, vector<16x128xf32>,
    return
  }
  func.func @transform_0(%arg0: i32) -> (i32, i32) {
    %c0_i32 = arith.constant 0 : i32
    %c0_i32_0 = arith.constant 0 : i32
    return %arg0, %c0_i32 : i32, i32
  }
  func.func @transform_1(%arg0: i32) -> (i32, i32) {
    %c0_i32 = arith.constant 0 : i32
    %c0_i32_0 = arith.constant 0 : i32
    %c0_i32_1 = arith.constant 0 : i32
    return %c0_i32, %c0_i32_0 : i32, i32
  }
  func.func @transform_2(%arg0: i32) -> (i32, i32) {
    %c0_i32 = arith.constant 0 : i32
    %c0_i32_0 = arith.constant 0 : i32
    %c0_i32_1 = arith.constant 0 : i32
    return %c0_i32, %c0_i32_0 : i32, i32
  }
  func.func @transform_3(%arg0: i32) -> (i32, i32) {
    %c0_i32 = arith.constant 0 : i32
    %c0_i32_0 = arith.constant 0 : i32
    %c0_i32_1 = arith.constant 0 : i32
    return %c0_i32, %c0_i32_0 : i32, i32
  }
  func.func @transform_4(%arg0: i32) -> (i32, i32) {
    %c0_i32 = arith.constant 0 : i32
    %c0_i32_0 = arith.constant 0 : i32
    %c0_i32_1 = arith.constant 0 : i32
    return %c0_i32, %c0_i32_0 : i32, i32
  }
  func.func @transform_5(%arg0: i32) -> (i32, i32) {
    %c0_i32 = arith.constant 0 : i32
    %c0_i32_0 = arith.constant 0 : i32
    %c0_i32_1 = arith.constant 0 : i32
    return %c0_i32, %c0_i32_0 : i32, i32
  }
  func.func @transform_6(%arg0: i32) -> (i32, i32) {
    %c0_i32 = arith.constant 0 : i32
    %c0_i32_0 = arith.constant 0 : i32
    %c0_i32_1 = arith.constant 0 : i32
    return %c0_i32, %c0_i32_0 : i32, i32
  }
  func.func @transform_7(%arg0: i32) -> (i32, i32) {
    %c0_i32 = arith.constant 0 : i32
    %c0_i32_0 = arith.constant 0 : i32
    return %arg0, %c0_i32 : i32, i32
  }
}

</mosaic_0001>

<bundles_post_ra>
// kernel: tpu_custom_call.1
= control target key start
LH: loop header
LB: loop body
LE: loop exit
PB: predicated region body
PF: predicated region fallthrough
CT: control target
= control target key end

     0   :  { %12 = vsyncpa [#allocation3], 0  ;;  %s1550_s0 = inlined_call_operand.hbm [shape: f32[16,32], index: 0, kind: input, shape index: {}]   ;;  %s1551_s1 = inlined_call_operand.hbm [shape: bf16[32,256], index: 1, kind: input, shape index: {}]   ;;  %s1552_s2 = inlined_call_operand.vmem [shape: f32[1,256], index: 2, kind: input, shape index: {}]   ;;  %s1553_s3 = inlined_call_operand.hbm [shape: bf16[256,512], index: 3, kind: input, shape index: {}]   ;;  %s1554_s4 = inlined_call_operand.vmem [shape: f32[1,512], index: 4, kind: input, shape index: {}]   ;;  %s1555_s5 = inlined_call_operand.hbm [shape: bf16[512,128], index: 5, kind: input, shape index: {}]   ;;  %s1556_s6 = inlined_call_operand.vmem [shape: f32[1,128], index: 6, kind: input, shape index: {}]   ;;  %s1557_s7 = inlined_call_operand.hbm [shape: f32[16,128], index: 7, kind: output, shape index: {}]  }
   0x1   :  { %13 = vsyncpa [#allocation6], 0 }
   0x2   :  { %14 = vsyncpa [#allocation9], 0 }
   0x3   :  { %15 = vsyncpa [#allocation4], 0  ;;  %s1451_s24 = smov [#allocation5]   ;;  %s1452_s26 = smov [#allocation2]  }
   0x4   :  { %s33_s25 = sshll.u32 %s1451_s24, 4  ;;  %s21_s27 = sshll.u32 %s1452_s26, 4  ;;  %s34_s25 = int_to_ptr.vmem [resolvable:$true] %s33_s25  ;;  %s22_s27 = int_to_ptr.vmem [resolvable:$true] %s21_s27 }
   0x5   :  { %s1351_s28 = scalar_lea.vmem %s34_s25, 512  ;;  %p1356_p1 = scmp.lt.s32.totalorder %s34_s25, %s34_s25 }
   0x6   :  { %p1352_p0 = scmp.ne.s32.totalorder %s34_s25, %s1351_s28  ;;  %p1357_p2 = scmp.lt.s32.totalorder %s1351_s28, %s1351_s28 }
   0x8   :  { %p1358_p3 = por %p1357_p2, %p1356_p1 }
   0xa   :  { %p1359_p4 = pnand %p1358_p3, %p1352_p0 }
   0xc   :  { %1362 = shalt.err (!%p1359_p4)
}
   0xd   :  { %s1453_s29 = smov 128   ;;  %s1454_s30 = smov 8  }
   0xe   :  { %39 = dma.hbm_to_vmem [thread:$0]  %s1551_s1, 512, %s34_s25, [#allocation6], %s1453_s29, %s1453_s29, %s1454_s30  }
   0xf   :  { %s1371_s10 = scalar_lea.vmem %s22_s27, 256  ;;  %p1376_p6 = scmp.lt.s32.totalorder %s22_s27, %s22_s27 }
  0x10   :  { %p1372_p5 = scmp.ne.s32.totalorder %s22_s27, %s1371_s10  ;;  %p1377_p7 = scmp.lt.s32.totalorder %s1371_s10, %s1371_s10 }
  0x12   :  { %p1378_p8 = por %p1377_p7, %p1376_p6 }
  0x14   :  { %p1379_p9 = pnand %p1378_p8, %p1372_p5 }
  0x16   :  { %1382 = shalt.err (!%p1379_p9)
}
  0x17   :  { %27 = dma.hbm_to_vmem [thread:$0]  %s1550_s0, 256, %s22_s27, [#allocation3], %s1453_s29, %s1453_s29, %s1454_s30  }
  0x18   :  { %s1455_s13 = smov [#allocation7]  }
  0x19   :  { %s47_s14 = sshll.u32 %s1455_s13, 4  ;;  %s48_s14 = int_to_ptr.vmem [resolvable:$true] %s47_s14 }
  0x1a   :  { %s1391_s15 = scalar_lea.vmem %s48_s14, 8192  ;;  %p1396_p11 = scmp.lt.s32.totalorder %s48_s14, %s48_s14 }
  0x1b   :  { %p1392_p10 = scmp.ne.s32.totalorder %s48_s14, %s1391_s15  ;;  %p1397_p12 = scmp.lt.s32.totalorder %s1391_s15, %s1391_s15 }
  0x1d   :  { %p1398_p13 = por %p1397_p12, %p1396_p11 }
  0x1f   :  { %p1399_p0 = pnand %p1398_p13, %p1392_p10 }
  0x21   :  { %1402 = shalt.err (!%p1399_p0)
}
  0x22   :  { %s1456_s1 = smov 256   ;;  %s1457_s16 = smov 16  }
  0x23   :  { %53 = dma.hbm_to_vmem [thread:$0]  %s1553_s3, 8192, %s48_s14, [#allocation6], %s1456_s1, %s1456_s1, %s1457_s16  }
  0x24   :  { %s1458_s19 = smov [#allocation8]  }
  0x25   :  { %s61_s20 = sshll.u32 %s1458_s19, 4  ;;  %s62_s20 = int_to_ptr.vmem [resolvable:$true] %s61_s20 }
  0x26   :  { %s1411_s0 = scalar_lea.vmem %s62_s20, 4096  ;;  %p1416_p2 = scmp.lt.s32.totalorder %s62_s20, %s62_s20 }
  0x27   :  { %p1412_p1 = scmp.ne.s32.totalorder %s62_s20, %s1411_s0  ;;  %p1417_p3 = scmp.lt.s32.totalorder %s1411_s0, %s1411_s0 }
  0x29   :  { %p1418_p4 = por %p1417_p3, %p1416_p2 }
  0x2b   :  { %p1419_p5 = pnand %p1418_p4, %p1412_p1 }
  0x2d   :  { %1422 = shalt.err (!%p1419_p5)
}
  0x2e   :  { %s1459_s21 = smov 64   ;;  %s1460_s22 = smov 4  }
  0x2f   :  { %67 = dma.hbm_to_vmem [thread:$0]  %s1555_s5, 4096, %s62_s20, [#allocation9], %s1459_s21, %s1459_s21, %s1460_s22  }
  0x30   :  { %1443 = dma.done.wait [#allocation3], 256  }
  0x31   :  { %1444 = vsyncadd [#allocation3], 4294967040 }
  0x32   :  { %1445 = dma.done.wait [#allocation6], 8704  }
  0x33   :  { %1446 = vsyncadd [#allocation6], 4294958592 }
  0x34   :  { %1447 = dma.done.wait [#allocation9], 4096  }
  0x35   :  { %1448 = vsyncadd [#allocation9], 4294963200  ;;  %v1461_v0 = vmov 0   ;;  %v1205_v1 = vld [vmem:[#allocation5 + $0x14] ss:$8 sps:$4 sm:$0xff]   ;;  %vm122_vm0 = vcmask 261120  }
  0x36   :  { %158 = vmatprep.mubr.bf16.mxu0 %v1461_v0  ;;  %v1207_v2 = vld [vmem:[#allocation5 + $0x10] ss:$8 sps:$4 sm:$0xff]   ;;  %138 = vmatprep.subr.bf16.mxu0 %v1205_v1  ;;  %v1208_v3 = vld [vmem:[#allocation5 + $0x4] ss:$8 sps:$4 sm:$0xff]   ;;  %v1210_v4 = vld [vmem:[#allocation5] ss:$8 sps:$4 sm:$0xff]  }
  0x37   :  { %v83_v5 = vld [vmem:[#allocation2] sm:$0xff]  ;;  %139 = vmatpush1.bf16.msra.mxu0 %v1207_v2  ;;  %v84_v6 = vld [vmem:[#allocation2 + $0x8] sm:$0xff]  ;;  %s1462_s27 = smov [#allocation10]  }
  0x38   :  { %140 = vmatprep.subr.bf16.mxu0 %v1208_v3  ;;  %v1211_v7 = vld [vmem:[#allocation7 + $0xe4] ss:$16 sps:$4 sm:$0xff]   ;;  %v1215_v8 = vld [vmem:[#allocation7 + $0xec] ss:$16 sps:$4 sm:$0xff]   ;;  %v1216_v9 = vld [vmem:[#allocation7 + $0xe0] ss:$16 sps:$4 sm:$0xff]   ;;  %v85_v10 = vpack.c.bf16 %v84_v6, %v83_v5 }
  0x39   :  { %581 = vmatprep.subr.bf16.mxu1 %v1211_v7  ;;  %v1217_v11 = vld [vmem:[#allocation7 + $0xc4] ss:$16 sps:$4 sm:$0xff]   ;;  %v1213_v12 = vld [vmem:[#allocation7 + $0xe8] ss:$16 sps:$4 sm:$0xff]   ;;  %v1221_v13 = vld [vmem:[#allocation7 + $0xcc] ss:$16 sps:$4 sm:$0xff]  }
  0x3a   :  { %582 = vmatpush1.bf16.msra.mxu1 %v1216_v9  ;;  %v1222_v14 = vld [vmem:[#allocation7 + $0xc0] ss:$16 sps:$4 sm:$0xff]   ;;  %v1223_v15 = vld [vmem:[#allocation7 + $0xa4] ss:$16 sps:$4 sm:$0xff]   ;;  %v1219_v16 = vld [vmem:[#allocation7 + $0xc8] ss:$16 sps:$4 sm:$0xff]  }
  0x3b   :  { %141 = vmatpush1.bf16.msra.mxu0 %v1210_v4  ;;  %583 = vmatprep.subr.bf16.mxu1 %v1217_v11  ;;  %v1227_v17 = vld [vmem:[#allocation7 + $0xac] ss:$16 sps:$4 sm:$0xff]   ;;  %v1228_v18 = vld [vmem:[#allocation7 + $0xa0] ss:$16 sps:$4 sm:$0xff]   ;;  %v1229_v19 = vld [vmem:[#allocation7 + $0x84] ss:$16 sps:$4 sm:$0xff]  }
  0x3c   :  { %624 = vmatprep.subr.bf16.mxu0 %v1215_v8  ;;  %v1225_v20 = vld [vmem:[#allocation7 + $0xa8] ss:$16 sps:$4 sm:$0xff]   ;;  %v1234_v21 = vld [vmem:[#allocation7 + $0x80] ss:$16 sps:$4 sm:$0xff]   ;;  %v1233_v22 = vld [vmem:[#allocation7 + $0x8c] ss:$16 sps:$4 sm:$0xff]  }
  0x3d   :  { %v1235_v23 = vld [vmem:[#allocation7 + $0x64] ss:$16 sps:$4 sm:$0xff]   ;;  %v1231_v24 = vld [vmem:[#allocation7 + $0x88] ss:$16 sps:$4 sm:$0xff]   ;;  %v1239_v25 = vld [vmem:[#allocation7 + $0x6c] ss:$16 sps:$4 sm:$0xff]  }
  0x3e   :  { %1051 = vmatmul.mubr.msk.bf16.vlgmr.msra.gmra.mxu0 %vm122_vm0, %v85_v10  ;;  %584 = vmatpush1.bf16.msra.mxu1 %v1222_v14  ;;  %v1240_v26 = vld [vmem:[#allocation7 + $0x60] ss:$16 sps:$4 sm:$0xff]   ;;  %v1241_v27 = vld [vmem:[#allocation7 + $0x44] ss:$16 sps:$4 sm:$0xff]   ;;  %v1237_v28 = vld [vmem:[#allocation7 + $0x68] ss:$16 sps:$4 sm:$0xff]   ;;  %v92_v10 = vlaneseq }
  0x3f   :  { %625 = vmatpush1.bf16.msra.mxu0 %v1213_v12  ;;  %585 = vmatprep.subr.bf16.mxu1 %v1223_v15  ;;  %v1246_v29 = vld [vmem:[#allocation7 + $0x40] ss:$16 sps:$4 sm:$0xff]   ;;  %v1245_v30 = vld [vmem:[#allocation7 + $0x4c] ss:$16 sps:$4 sm:$0xff]   ;;  %v1247_v31 = vld [vmem:[#allocation7 + $0x24] ss:$16 sps:$4 sm:$0xff]  }
  0x40   :  { %626 = vmatprep.subr.bf16.mxu0 %v1221_v13  ;;  %v1243_v32 = vld [vmem:[#allocation7 + $0x48] ss:$16 sps:$4 sm:$0xff]   ;;  %v1251_v33 = vld [vmem:[#allocation7 + $0x2c] ss:$16 sps:$4 sm:$0xff]   ;;  %v1252_v34 = vld [vmem:[#allocation7 + $0x20] ss:$16 sps:$4 sm:$0xff]  }
  0x41   :  { %v1253_v35 = vld [vmem:[#allocation7 + $0x4] ss:$16 sps:$4 sm:$0xff]   ;;  %v1249_v36 = vld [vmem:[#allocation7 + $0x28] ss:$16 sps:$4 sm:$0xff]   ;;  %v1258_v37 = vld [vmem:[#allocation7] ss:$16 sps:$4 sm:$0xff]  }
  0x42   :  { %586 = vmatpush1.bf16.msra.mxu1 %v1228_v18  ;;  %v1257_v38 = vld [vmem:[#allocation7 + $0xc] ss:$16 sps:$4 sm:$0xff]   ;;  %v1259_v39 = vld [vmem:[#allocation7 + $0x1e4] ss:$16 sps:$4 sm:$0xff]   ;;  %v1255_v40 = vld [vmem:[#allocation7 + $0x8] ss:$16 sps:$4 sm:$0xff]  }
  0x43   :  { %627 = vmatpush1.bf16.msra.mxu0 %v1219_v16  ;;  %587 = vmatprep.subr.bf16.mxu1 %v1229_v19  ;;  %v1263_v41 = vld [vmem:[#allocation7 + $0x1ec] ss:$16 sps:$4 sm:$0xff]   ;;  %v1264_v42 = vld [vmem:[#allocation7 + $0x1e0] ss:$16 sps:$4 sm:$0xff]   ;;  %v1265_v43 = vld [vmem:[#allocation7 + $0x1c4] ss:$16 sps:$4 sm:$0xff]  }
  0x44   :  { %628 = vmatprep.subr.bf16.mxu0 %v1227_v17  ;;  %v1261_v44 = vld [vmem:[#allocation7 + $0x1e8] ss:$16 sps:$4 sm:$0xff]   ;;  %v1270_v45 = vld [vmem:[#allocation7 + $0x1c0] ss:$16 sps:$4 sm:$0xff]   ;;  %v1269_v46 = vld [vmem:[#allocation7 + $0x1cc] ss:$16 sps:$4 sm:$0xff]  }
  0x45   :  { %v1271_v47 = vld [vmem:[#allocation7 + $0x1a4] ss:$16 sps:$4 sm:$0xff]   ;;  %v1267_v48 = vld [vmem:[#allocation7 + $0x1c8] ss:$16 sps:$4 sm:$0xff]   ;;  %v1276_v49 = vld [vmem:[#allocation7 + $0x1a0] ss:$16 sps:$4 sm:$0xff]  }
  0x46   :  { %588 = vmatpush1.bf16.msra.mxu1 %v1234_v21  ;;  %v1275_v50 = vld [vmem:[#allocation7 + $0x1ac] ss:$16 sps:$4 sm:$0xff]   ;;  %v1277_v51 = vld [vmem:[#allocation7 + $0x184] ss:$16 sps:$4 sm:$0xff]   ;;  %v1273_v52 = vld [vmem:[#allocation7 + $0x1a8] ss:$16 sps:$4 sm:$0xff]  }
  0x47   :  { %629 = vmatpush1.bf16.msra.mxu0 %v1225_v20  ;;  %589 = vmatprep.subr.bf16.mxu1 %v1235_v23  ;;  %v1282_v53 = vld [vmem:[#allocation7 + $0x180] ss:$16 sps:$4 sm:$0xff]   ;;  %v1281_v54 = vld [vmem:[#allocation7 + $0x18c] ss:$16 sps:$4 sm:$0xff]   ;;  %v1283_v55 = vld [vmem:[#allocation7 + $0x164] ss:$16 sps:$4 sm:$0xff]  }
  0x48   :  { %630 = vmatprep.subr.bf16.mxu0 %v1233_v22  ;;  %v1279_v56 = vld [vmem:[#allocation7 + $0x188] ss:$16 sps:$4 sm:$0xff]   ;;  %v1288_v57 = vld [vmem:[#allocation7 + $0x160] ss:$16 sps:$4 sm:$0xff]   ;;  %v1287_v58 = vld [vmem:[#allocation7 + $0x16c] ss:$16 sps:$4 sm:$0xff]  }
  0x49   :  { %v1285_v59 = vld [vmem:[#allocation7 + $0x168] ss:$16 sps:$4 sm:$0xff]   ;;  %v1289_v60 = vld [vmem:[#allocation7 + $0x144] ss:$16 sps:$4 sm:$0xff]   ;;  %v1293_v61 = vld [vmem:[#allocation7 + $0x14c] ss:$16 sps:$4 sm:$0xff]  }
  0x4a   :  { %590 = vmatpush1.bf16.msra.mxu1 %v1240_v26  ;;  %v1291_v62 = vld [vmem:[#allocation7 + $0x148] ss:$16 sps:$4 sm:$0xff]   ;;  %v1294_v63 = vld [vmem:[#allocation7 + $0x140] ss:$16 sps:$4 sm:$0xff]   ;;  %v1295_v0 = vld [vmem:[#allocation7 + $0x124] ss:$16 sps:$4 sm:$0xff]  }
  0x4b   :  { %631 = vmatpush1.bf16.msra.mxu0 %v1231_v24  ;;  %591 = vmatprep.subr.bf16.mxu1 %v1241_v27  ;;  %v1299_v1 = vld [vmem:[#allocation7 + $0x12c] ss:$16 sps:$4 sm:$0xff]   ;;  %v1297_v2 = vld [vmem:[#allocation7 + $0x128] ss:$16 sps:$4 sm:$0xff]   ;;  %v1300_v3 = vld [vmem:[#allocation7 + $0x120] ss:$16 sps:$4 sm:$0xff]  }
  0x4c   :  { %632 = vmatprep.subr.bf16.mxu0 %v1239_v25  ;;  %v1301_v4 = vld [vmem:[#allocation7 + $0x104] ss:$16 sps:$4 sm:$0xff]   ;;  %v1305_v5 = vld [vmem:[#allocation7 + $0x10c] ss:$16 sps:$4 sm:$0xff]   ;;  %v1303_v6 = vld [vmem:[#allocation7 + $0x108] ss:$16 sps:$4 sm:$0xff]  }
  0x4d   :  { %v1306_v7 = vld [vmem:[#allocation7 + $0x100] ss:$16 sps:$4 sm:$0xff]   ;;  %v1307_v8 = vld [vmem:[#allocation8 + $0x78] sm:$0xff]   ;;  %v1521_v11 = vshrl.u32 %v92_v10, 7  ;;  %s1033_s28 = sshll.u32 %s1462_s27, 4  ;;  %s1034_s28 = int_to_ptr.vmem [resolvable:$true] %s1033_s28 }
  0x4e   :  { %592 = vmatpush1.bf16.msra.mxu1 %v1246_v29  ;;  %v1308_v9 = vld [vmem:[#allocation8 + $0xf8] sm:$0xff]   ;;  %v90_v14 = vld [vmem:[%s1552_s2] sm:$0x3]  ;;  %p1428_p7 = scmp.lt.s32.totalorder %s1034_s28, %s1034_s28 }
  0x4f   :  { %633 = vmatpush1.bf16.msra.mxu0 %v1237_v28  ;;  %593 = vmatprep.subr.bf16.mxu1 %v1247_v31  ;;  %v98_v12 = vsub.s32 1, %v1521_v11  ;;  %v94_v13 = vsub.s32 0, %v1521_v11  ;;  %v1310_v31 = vld [vmem:[#allocation8 + $0xb8] sm:$0xff]  }
  0x50   :  { %634 = vmatprep.subr.bf16.mxu0 %v1245_v30  ;;  %v1309_v30 = vld [vmem:[#allocation8 + $0x38] sm:$0xff]  }
  0x51   :  { %v99_v16 = vrot.slane %v90_v14, %v98_v12  ;;  %v95_v17 = vrot.slane %v90_v14, %v94_v13 }
  0x52   :  { %594 = vmatpush1.bf16.msra.mxu1 %v1252_v34  ;;  %v1312_v34 = vld [vmem:[#allocation8 + $0xf0] sm:$0xff]  }
  0x53   :  { %635 = vmatpush1.bf16.msra.mxu0 %v1243_v32  ;;  %595 = vmatprep.subr.bf16.mxu1 %v1253_v35  ;;  %v1313_v35 = vld [vmem:[#allocation8 + $0x30] sm:$0xff]  }
  0x54   :  { %636 = vmatprep.subr.bf16.mxu0 %v1251_v33  ;;  %v1311_v33 = vld [vmem:[#allocation8 + $0x70] sm:$0xff]  }
  0x56   :  { %596 = vmatpush1.bf16.msra.mxu1 %v1258_v37  ;;  %v1315_v37 = vld [vmem:[#allocation8 + $0x68] sm:$0xff]  }
  0x57   :  { %637 = vmatpush1.bf16.msra.mxu0 %v1249_v36  ;;  %597 = vmatprep.subr.bf16.mxu1 %v1259_v39  ;;  %v1314_v36 = vld [vmem:[#allocation8 + $0xb0] sm:$0xff]   ;;  %v1317_v39 = vld [vmem:[#allocation8 + $0x28] sm:$0xff]  }
  0x58   :  { %638 = vmatprep.subr.bf16.mxu0 %v1257_v38  ;;  %v1316_v38 = vld [vmem:[#allocation8 + $0xe8] sm:$0xff]  }
  0x5a   :  { %598 = vmatpush2.bf16.msra.mxu1 %v1264_v42  ;;  %v1320_v42 = vld [vmem:[#allocation8 + $0xe0] sm:$0xff]  }
  0x5b   :  { %639 = vmatpush1.bf16.msra.mxu0 %v1255_v40  ;;  %599 = vmatprep.subr.bf16.mxu1 %v1265_v43  ;;  %v1318_v40 = vld [vmem:[#allocation8 + $0xa8] sm:$0xff]   ;;  %v1321_v43 = vld [vmem:[#allocation8 + $0x20] sm:$0xff]  }
  0x5c   :  { %640 = vmatprep.subr.bf16.mxu0 %v1263_v41  ;;  %v1319_v41 = vld [vmem:[#allocation8 + $0x60] sm:$0xff]  }
  0x5e   :  { %600 = vmatpush2.bf16.msra.mxu1 %v1270_v45  ;;  %v1323_v45 = vld [vmem:[#allocation8 + $0x58] sm:$0xff]  }
  0x5f   :  { %641 = vmatpush2.bf16.msra.mxu0 %v1261_v44  ;;  %601 = vmatprep.subr.bf16.mxu1 %v1271_v47  ;;  %v1322_v44 = vld [vmem:[#allocation8 + $0xa0] sm:$0xff]   ;;  %v1325_v47 = vld [vmem:[#allocation8 + $0x18] sm:$0xff]  }
  0x60   :  { %642 = vmatprep.subr.bf16.mxu0 %v1269_v46  ;;  %v1324_v46 = vld [vmem:[#allocation8 + $0xd8] sm:$0xff]  }
  0x62   :  { %602 = vmatpush2.bf16.msra.mxu1 %v1276_v49  ;;  %v1327_v49 = vld [vmem:[#allocation8 + $0x50] sm:$0xff]  }
  0x63   :  { %643 = vmatpush2.bf16.msra.mxu0 %v1267_v48  ;;  %603 = vmatprep.subr.bf16.mxu1 %v1277_v51  ;;  %v1326_v48 = vld [vmem:[#allocation8 + $0x98] sm:$0xff]   ;;  %v1329_v51 = vld [vmem:[#allocation8 + $0x10] sm:$0xff]  }
  0x64   :  { %644 = vmatprep.subr.bf16.mxu0 %v1275_v50  ;;  %v1328_v50 = vld [vmem:[#allocation8 + $0xd0] sm:$0xff]  }
  0x66   :  { %604 = vmatpush2.bf16.msra.mxu1 %v1282_v53  ;;  %v1331_v53 = vld [vmem:[#allocation8 + $0x48] sm:$0xff]  }
  0x67   :  { %645 = vmatpush2.bf16.msra.mxu0 %v1273_v52  ;;  %605 = vmatprep.subr.bf16.mxu1 %v1283_v55  ;;  %v1330_v52 = vld [vmem:[#allocation8 + $0x90] sm:$0xff]   ;;  %v1333_v55 = vld [vmem:[#allocation8 + $0x8] sm:$0xff]  }
  0x68   :  { %646 = vmatprep.subr.bf16.mxu0 %v1281_v54  ;;  %v1332_v54 = vld [vmem:[#allocation8 + $0xc8] sm:$0xff]  }
  0x6a   :  { %606 = vmatpush2.bf16.msra.mxu1 %v1288_v57  ;;  %v1335_v57 = vld [vmem:[#allocation8 + $0x40] sm:$0xff]  }
  0x6b   :  { %647 = vmatpush2.bf16.msra.mxu0 %v1279_v56  ;;  %607 = vmatprep.subr.bf16.mxu1 %v1289_v60  ;;  %v1334_v56 = vld [vmem:[#allocation8 + $0x88] sm:$0xff]   ;;  %v1338_v60 = vld [vmem:[#allocation8 + $0x80] sm:$0xff]  }
  0x6c   :  { %648 = vmatprep.subr.bf16.mxu0 %v1287_v58  ;;  %v1336_v58 = vld [vmem:[#allocation8 + $0xc0] sm:$0xff]  }
  0x6e   :  { %608 = vmatpush2.bf16.msra.mxu1 %v1294_v63  ;;  %v239_v63 = vld [vmem:[%s1554_s4] sm:$0xf] }
  0x6f   :  { %649 = vmatpush2.bf16.msra.mxu0 %v1285_v59  ;;  %609 = vmatprep.subr.bf16.mxu1 %v1295_v0  ;;  %v1337_v59 = vld [vmem:[#allocation8] sm:$0xff]  }
  0x70   :  { %650 = vmatprep.subr.bf16.mxu0 %v1293_v61  ;;  %v255_v61 = vsub.s32 3, %v1521_v11 }
  0x72   :  { %610 = vmatpush2.bf16.msra.mxu1 %v1300_v3  ;;  %v256_v3 = vrot.slane %v239_v63, %v255_v61 }
  0x73   :  { %651 = vmatpush2.bf16.msra.mxu0 %v1291_v62  ;;  %611 = vmatprep.subr.bf16.mxu1 %v1301_v4  ;;  %v251_v62 = vsub.s32 2, %v1521_v11  ;;  %v244_v4 = vrot.slane %v239_v63, %v94_v13 }
  0x74   :  { %652 = vmatprep.subr.bf16.mxu0 %v1299_v1 }
  0x76   :  { %612 = vmatpush2.bf16.msra.mxu1 %v1306_v7 }
  0x77   :  { %653 = vmatpush2.bf16.msra.mxu0 %v1297_v2  ;;  %1149 = vmatprep.subr.bf16.mxu1 %v1307_v8  ;;  %v248_v2 = vrot.slane %v239_v63, %v98_v12 }
  0x78   :  { %654 = vmatprep.subr.bf16.mxu0 %v1305_v5  ;;  %v252_v5 = vrot.slane %v239_v63, %v251_v62 }
  0x7b   :  { %655 = vmatpush2.bf16.msra.mxu0 %v1303_v6 }
  0x7c   :  { %1171 = vmatprep.subr.bf16.mxu0 %v1308_v9 }
  0xfe   :  { %v160_v15 = vpop.f32.mrf.mxu0 }
  0xff   :  { %v161_v22 = vadd.f32 %v160_v15, %v95_v17 }
 0x100   :  { %v162_v18 = vpop.f32.mrf.mxu0 }
 0x101   :  { %v163_v20 = vadd.f32 %v162_v18, %v99_v16  ;;  %v169_v28 = vmax.f32 %v161_v22, 0.0 }
 0x102   :  { %v164_v19 = vpop.f32.mrf.mxu0 }
 0x103   :  { %v165_v21 = vadd.f32 %v164_v19, %v95_v17  ;;  %v170_v26 = vmax.f32 %v163_v20, 0.0 }
 0x104   :  { %v166_v23 = vpop.f32.mrf.mxu0 }
 0x105   :  { %v167_v24 = vadd.f32 %v166_v23, %v99_v16  ;;  %v171_v25 = vmax.f32 %v165_v21, 0.0 }
 0x107   :  { %v172_v27 = vmax.f32 %v167_v24, 0.0  ;;  %v173_v32 = vpack.c.bf16 %v171_v25, %v169_v28 }
 0x109   :  { %v174_v29 = vpack.c.bf16 %v172_v27, %v170_v26 }
 0x10b   :  { %613 = vmatprep.mubr.bf16.mxu1 %v174_v29  ;;  %656 = vmatprep.mubr.bf16.mxu0 %v174_v29 }
 0x10c   :  { %614 = vmatmul.mubr.bf16.vlgmr.msra.gmra.mxu1 %v173_v32  ;;  %657 = vmatmul.mubr.bf16.vlgmr.msra.gmra.mxu0 %v173_v32 }
 0x10d   :  { %1150 = vmatpush3.bf16.msra.mxu1 %v1309_v30  ;;  %1172 = vmatpush3.bf16.msra.mxu0 %v1310_v31 }
 0x10e   :  { %1151 = vmatprep.subr.bf16.mxu1 %v1311_v33  ;;  %1173 = vmatprep.subr.bf16.mxu0 %v1312_v34  ;;  %v1116_v34 = vld [vmem:[%s1556_s6] ss:$0 sm:$0xff]  ;;  %s1423_s6 = scalar_lea.vmem %s1034_s28, 256 }
 0x10f   :  { %p1424_p6 = scmp.ne.s32.totalorder %s1034_s28, %s1423_s6  ;;  %p1429_p8 = scmp.lt.s32.totalorder %s1423_s6, %s1423_s6 }
 0x111   :  { %1152 = vmatpush3.bf16.msra.mxu1 %v1313_v35  ;;  %1174 = vmatpush3.bf16.msra.mxu0 %v1314_v36  ;;  %p1430_p9 = por %p1429_p8, %p1428_p7 }
 0x112   :  { %1153 = vmatprep.subr.bf16.mxu1 %v1315_v37  ;;  %1175 = vmatprep.subr.bf16.mxu0 %v1316_v38 }
 0x113   :  { %p1431_p10 = pnand %p1430_p9, %p1424_p6 }
 0x115   :  { %1154 = vmatpush3.bf16.msra.mxu1 %v1317_v39  ;;  %1176 = vmatpush3.bf16.msra.mxu0 %v1318_v40 }
 0x116   :  { %1155 = vmatprep.subr.bf16.mxu1 %v1319_v41  ;;  %1177 = vmatprep.subr.bf16.mxu0 %v1320_v42 }
 0x119   :  { %1156 = vmatpush3.bf16.msra.mxu1 %v1321_v43  ;;  %1178 = vmatpush3.bf16.msra.mxu0 %v1322_v44 }
 0x11a   :  { %1157 = vmatprep.subr.bf16.mxu1 %v1323_v45  ;;  %1179 = vmatprep.subr.bf16.mxu0 %v1324_v46 }
 0x11d   :  { %1158 = vmatpush3.bf16.msra.mxu1 %v1325_v47  ;;  %1180 = vmatpush3.bf16.msra.mxu0 %v1326_v48 }
 0x11e   :  { %1159 = vmatprep.subr.bf16.mxu1 %v1327_v49  ;;  %1181 = vmatprep.subr.bf16.mxu0 %v1328_v50 }
 0x121   :  { %1160 = vmatpush3.bf16.msra.mxu1 %v1329_v51  ;;  %1182 = vmatpush3.bf16.msra.mxu0 %v1330_v52 }
 0x122   :  { %1161 = vmatprep.subr.bf16.mxu1 %v1331_v53  ;;  %1183 = vmatprep.subr.bf16.mxu0 %v1332_v54 }
 0x125   :  { %1162 = vmatpush3.bf16.msra.mxu1 %v1333_v55  ;;  %1184 = vmatpush3.bf16.msra.mxu0 %v1334_v56 }
 0x126   :  { %1163 = vmatprep.subr.bf16.mxu1 %v1335_v57  ;;  %1185 = vmatprep.subr.bf16.mxu0 %v1336_v58 }
 0x129   :  { %1164 = vmatpush3.bf16.msra.mxu1 %v1337_v59  ;;  %1186 = vmatpush3.bf16.msra.mxu0 %v1338_v60 }
 0x1cc   :  { %v615_v0 = vpop.f32.mrf.mxu1  ;;  %v658_v1 = vpop.f32.mrf.mxu0 }
 0x1cd   :  { %v616_v17 = vadd.f32 %v615_v0, %v244_v4  ;;  %v659_v18 = vadd.f32 %v658_v1, %v252_v5 }
 0x1ce   :  { %v617_v6 = vpop.f32.mrf.mxu1  ;;  %v660_v7 = vpop.f32.mrf.mxu0 }
 0x1cf   :  { %v618_v10 = vadd.f32 %v617_v6, %v248_v2  ;;  %v661_v14 = vadd.f32 %v660_v7, %v256_v3  ;;  %v667_v26 = vmax.f32 %v616_v17, 0.0  ;;  %v669_v27 = vmax.f32 %v659_v18, 0.0 }
 0x1d0   :  { %v619_v8 = vpop.f32.mrf.mxu1  ;;  %v662_v9 = vpop.f32.mrf.mxu0 }
 0x1d1   :  { %v620_v15 = vadd.f32 %v619_v8, %v244_v4  ;;  %v663_v16 = vadd.f32 %v662_v9, %v252_v5  ;;  %v668_v24 = vmax.f32 %v618_v10, 0.0  ;;  %v670_v11 = vmax.f32 %v661_v14, 0.0 }
 0x1d2   :  { %v621_v19 = vpop.f32.mrf.mxu1  ;;  %v664_v20 = vpop.f32.mrf.mxu0 }
 0x1d3   :  { %v622_v21 = vadd.f32 %v621_v19, %v248_v2  ;;  %v665_v22 = vadd.f32 %v664_v20, %v256_v3  ;;  %v671_v12 = vmax.f32 %v620_v15, 0.0  ;;  %v673_v23 = vmax.f32 %v663_v16, 0.0 }
 0x1d5   :  { %v672_v13 = vmax.f32 %v622_v21, 0.0  ;;  %v674_v25 = vmax.f32 %v665_v22, 0.0  ;;  %v675_v30 = vpack.c.bf16 %v671_v12, %v667_v26  ;;  %v677_v31 = vpack.c.bf16 %v673_v23, %v669_v27 }
 0x1d7   :  { %v676_v28 = vpack.c.bf16 %v672_v13, %v668_v24  ;;  %v678_v29 = vpack.c.bf16 %v674_v25, %v670_v11 }
 0x1d9   :  { %974 = vmatprep.mubr.bf16.mxu1 %v676_v28  ;;  %1015 = vmatprep.mubr.bf16.mxu0 %v678_v29 }
 0x1da   :  { %975 = vmatmul.mubr.bf16.vlgmr.msra.gmra.mxu1 %v675_v30  ;;  %1016 = vmatmul.mubr.bf16.vlgmr.msra.gmra.mxu0 %v677_v31 }
 0x29a   :  { %v1165_v32 = vpop.f32.mrf.mxu1  ;;  %v1187_v33 = vpop.f32.mrf.mxu0 }
 0x29c   :  { %v1166_v35 = vpop.f32.mrf.mxu1  ;;  %v1188_v36 = vpop.f32.mrf.mxu0 }
 0x29d   :  { %v1167_v37 = vadd.f32 %v1166_v35, %v1165_v32  ;;  %v1189_v41 = vadd.f32 %v1188_v36, %v1187_v33 }
 0x29e   :  { %v1168_v38 = vpop.f32.mrf.mxu1  ;;  %v1190_v39 = vpop.f32.mrf.mxu0 }
 0x29f   :  { %v977_v40 = vadd.f32 %v1167_v37, %v1116_v34 }
 0x2a0   :  { %v1169_v42 = vpop.f32.mrf.mxu1  ;;  %v1191_v43 = vpop.f32.mrf.mxu0 }
 0x2a1   :  { %v1018_v44 = vadd.f32 %v1189_v41, %v977_v40  ;;  %v1170_v45 = vadd.f32 %v1169_v42, %v1168_v38  ;;  %v1192_v47 = vadd.f32 %v1191_v43, %v1190_v39 }
 0x2a3   :  { %1339 = vtanh.f32 %v1018_v44  ;;  %v980_v46 = vadd.f32 %v1170_v45, %v1116_v34 }
 0x2a5   :  { %v1021_v48 = vadd.f32 %v1192_v47, %v980_v46 }
 0x2a7   :  { %1341 = vtanh.f32 %v1021_v48 }
 0x2b0   :  { %v1340_v49 = vpop.eup %1339 }
 0x2b1   :  { %1026 = vst [vmem:[#allocation10] sm:$0xff] %v1340_v49 }
 0x2b4   :  { %v1342_v50 = vpop.eup %1341 }
 0x2b5   :  { %1027 = vst [vmem:[#allocation10 + $0x8] sm:$0xff] %v1342_v50 }
 0x2b6   :  { %1434 = shalt.err (!%p1431_p10)
}
 0x2b7   :  { %1039 = dma.vmem_to_hbm [thread:$0]  %s1034_s28, 256, %s1557_s7, [#allocation4], %s1453_s29, %s1453_s29, %s1454_s30  }
 0x2b8   :  { %1449 = dma.done.wait [#allocation4], 256  }
 0x2b9   :  { %1450 = vsyncadd [#allocation4], 4294967040 }
 0x2ba   :  { %1043 = vsyncpa [#allocation3], 1 }
 0x2bb   :  { %1044 = vsyncpa [#allocation6], 1 }
 0x2bc   :  { %1045 = vsyncpa [#allocation9], 1 }
 0x2bd   :  { %1046 = vsyncpa [#allocation4], 1 }

</bundles_post_ra>
